<compile_context>
chip_gen: v6e
topology: v6e:2x2x1
jax: 0.10.0
libtpu: 0.0.40
codegen_flags: <defaults>
</compile_context>

<pallas_src>
import numpy as np
import jax
import jax.numpy as jnp
from jax.experimental import pallas as pl
from jax.experimental.pallas import tpu as pltpu

NUM_AA = 20
NUM_BB = 4                      # backbone atoms N, CA, C, O
NUM_SC = 10                     # side-chain atom slots
NUM_ATOMS14 = NUM_BB + NUM_SC   # 14
ROW = 3 * NUM_ATOMS14           # 42 floats per residue (atom-major, coord-minor)
AA20 = 'ARNDCQEGHILKMFPSTWYV'


def build_symmetry_table():
    """Stand-in for the module's `_symmetry_indices` buffer, shape (20, 10)."""
    table = np.tile(np.arange(NUM_SC, dtype=np.int32), (NUM_AA, 1))
    # side-chain-local indices (atom14 order minus the 4 backbone atoms)
    swaps = {
        'D': [(2, 3)],           # OD1 <-> OD2
        'E': [(3, 4)],           # OE1 <-> OE2
        'F': [(2, 3), (4, 5)],   # CD1<->CD2, CE1<->CE2
        'Y': [(2, 3), (4, 5)],   # CD1<->CD2, CE1<->CE2
        'R': [(5, 6)],           # NH1 <-> NH2
    }
    for aa, pairs in swaps.items():
        i = AA20.index(aa)
        for a, b in pairs:
            table[i, a] = b
            table[i, b] = a
    return table


# -------------------- Pallas kernel (specialized on the table) --------------------

def make_renamer_kernel(table):
    """Build a kernel closure specialized to the (20, 10) symmetry-index table."""
    table = np.asarray(table, np.int32)
    assert table.shape == (NUM_AA, NUM_SC)

    # sources[j] = {k: [aa, ...]}: output side-chain slot j takes slot k (!= j)
    # for residues whose amino acid is in the list.
    sources = []
    for j in range(NUM_SC):
        srcs = {}
        for aa in range(NUM_AA):
            k = int(table[aa, j])
            if k != j:
                srcs.setdefault(k, []).append(aa)
        sources.append(srcs)

    # Distinct AA groups: each OR-chain mask is built once per tile and shared
    # across atom slots and across both directions of a symmetric pair.
    aa_groups = sorted({tuple(aas) for srcs in sources for aas in srcs.values()})

    def kernel(s_ref, x_ref, o_ref):
        # s_ref: (t, 1) int32 sequence tokens
        # x_ref / o_ref: (t, 42) coords; residues on sublanes, atom*3+coord on lanes.
        o_ref[...] = x_ref[...]                       # streamed identity copy

        t = s_ref.shape[0]
        S3 = jnp.broadcast_to(s_ref[...], (t, 3))     # token replicated on 3 coord lanes

        masks = {}
        for aas in aa_groups:
            m = (S3 == aas[0])
            for aa in aas[1:]:
                m = jnp.logical_or(m, S3 == aa)
            masks[aas] = m                            # (t, 3) bool

        for j in range(NUM_SC):
            if not sources[j]:
                continue                              # slot never renamed: copy above suffices
            lj = 3 * (NUM_BB + j)
            acc = x_ref[:, lj:lj + 3]                 # identity source
            for k in sorted(sources[j]):
                lk = 3 * (NUM_BB + k)
                m = masks[tuple(sources[j][k])]
                acc = jnp.where(m, x_ref[:, lk:lk + 3], acc)
            o_ref[:, lj:lj + 3] = acc                 # masked 3-lane re-store

    return kernel


# -------------------- wrapper --------------------

def sidechain_symmetry_renamer(X, S, symmetry_table, residue_tile=4096):
    """X: (B, L, 14, 3) float (any dtype), S: (B, L) int tokens in [0, 20)."""
    B, L, A, C = X.shape
    assert A == NUM_ATOMS14 and C == 3
    N = B * L

    # Free views only -- no extra HBM passes over X, native dtype preserved.
    Xf = X.reshape(N, ROW)
    Sf = S.reshape(N, 1).astype(jnp.int32)

    if N <= residue_tile:
        t = N                                   # block == full dim: always legal
    else:
        t = max(8, (residue_tile // 8) * 8)     # sublane-aligned tile; grid >= 2
    grid = (pl.cdiv(N, t),)                     # ragged last block handled by Pallas masking

    kernel = make_renamer_kernel(symmetry_table)

    xout = pl.pallas_call(
        kernel,
        out_shape=jax.ShapeDtypeStruct((N, ROW), X.dtype),
        grid=grid,
        in_specs=[
            pl.BlockSpec((t, 1), lambda i: (i, 0)),      # S tokens
            pl.BlockSpec((t, ROW), lambda i: (i, 0)),    # X coords
        ],
        out_specs=pl.BlockSpec((t, ROW), lambda i: (i, 0)),
        compiler_params=pltpu.CompilerParams(
            dimension_semantics=("parallel",),
            vmem_limit_bytes=32 * 1024 * 1024,
        ),
    )(Sf, Xf)

    return xout.reshape(B, L, A, 3)


# -------------------- pure-JAX reference (mirrors the torch forward) --------------------

def reference(X, S, table):
    tab = jnp.asarray(np.asarray(table), jnp.int32)
    alt = tab[S]                                        # (B, L, 10)
    X_bb, X_sc = X[:, :, :NUM_BB, :], X[:, :, NUM_BB:, :]
    idx = jnp.broadcast_to(alt[..., None], X_sc.shape)
    X_sc_alt = jnp.take_along_axis(X_sc, idx, axis=2)
    return jnp.concatenate([X_bb, X_sc_alt], axis=2)


if __name__ == "__main__":
    key = jax.random.PRNGKey(0)
    k1, k2 = jax.random.split(key)
    B, L = 2, 8
    X = jax.random.normal(k1, (B, L, NUM_ATOMS14, 3), jnp.float32) * 3.0
    S = jax.random.randint(k2, (B, L), 0, NUM_AA)

    table = build_symmetry_table()
    renamer = jax.jit(lambda x, s: sidechain_symmetry_renamer(x, s, table))

    X_renamed = renamer(X, S)
    jax.block_until_ready(X_renamed)

    X_ref = reference(X, S, table)
    assert X_renamed.shape == (B, L, NUM_ATOMS14, 3)
    assert X_renamed.dtype == X.dtype
    assert np.array_equal(np.asarray(X_renamed), np.asarray(X_ref))
    print("KERNEL_OK")
</pallas_src>

<mosaic_0001>
module attributes {stable_mosaic.version = 11 : i64} {
  func.func @kernel(%arg0: i32, %arg1: memref<16x1xi32, #tpu.memory_space<vmem>>, %arg2: memref<16x42xf32, #tpu.memory_space<vmem>>, %arg3: memref<16x42xf32, #tpu.memory_space<vmem>>) attributes {dimension_semantics = [#tpu.dimension_semantics<parallel>], iteration_bounds = array<i64: 1>, scalar_prefetch = 0 : i64, scratch_operands = 0 : i64, tpu.core_type = #tpu.core_type<tc>, window_params = [{transform_indices = @transform_0, window_bounds = array<i64: 16, 1>}, {transform_indices = @transform_1, window_bounds = array<i64: 16, 42>}, {transform_indices = @transform_2, window_bounds = array<i64: 16, 42>}]} {
    %c0 = arith.constant 0 : index
    %c0_0 = arith.constant 0 : index
    %0 = vector.load %arg2[%c0, %c0_0] : memref<16x42xf32, #tpu.memory_space<vmem>>, vector<16x42xf32>
    %c0_1 = arith.constant 0 : index
    %c0_2 = arith.constant 0 : index
    %1 = vector.load %arg3[%c0_1, %c0_2] : memref<16x42xf32, #tpu.memory_space<vmem>>, vector<16x42xf32>
    tpu.vector_store %arg3[%c0_1, %c0_2], %0 {strides = array<i32>} : memref<16x42xf32, #tpu.memory_space<vmem>>, vector<16x42xf32>,
    %c0_3 = arith.constant 0 : index
    %c0_4 = arith.constant 0 : index
    %2 = vector.load %arg1[%c0_3, %c0_4] : memref<16x1xi32, #tpu.memory_space<vmem>>, vector<16x1xi32>
    %3 = vector.shape_cast %2 : vector<16x1xi32> to vector<16x1xi32>
    %4 = vector.broadcast %3 : vector<16x1xi32> to vector<16x3xi32>
    %c1_i32 = arith.constant 1 : i32
    %5 = vector.broadcast %c1_i32 : i32 to vector<16x3xi32>
    %6 = arith.cmpi eq, %4, %5 : vector<16x3xi32>
    %c3_i32 = arith.constant 3 : i32
    %7 = vector.broadcast %c3_i32 : i32 to vector<16x3xi32>
    %8 = arith.cmpi eq, %4, %7 : vector<16x3xi32>
    %c13_i32 = arith.constant 13 : i32
    %9 = vector.broadcast %c13_i32 : i32 to vector<16x3xi32>
    %10 = arith.cmpi eq, %4, %9 : vector<16x3xi32>
    %11 = arith.ori %8, %10 : vector<16x3xi1>
    %c18_i32 = arith.constant 18 : i32
    %12 = vector.broadcast %c18_i32 : i32 to vector<16x3xi32>
    %13 = arith.cmpi eq, %4, %12 : vector<16x3xi32>
    %14 = arith.ori %11, %13 : vector<16x3xi1>
    %c6_i32 = arith.constant 6 : i32
    %15 = vector.broadcast %c6_i32 : i32 to vector<16x3xi32>
    %16 = arith.cmpi eq, %4, %15 : vector<16x3xi32>
    %c13_i32_5 = arith.constant 13 : i32
    %17 = vector.broadcast %c13_i32_5 : i32 to vector<16x3xi32>
    %18 = arith.cmpi eq, %4, %17 : vector<16x3xi32>
    %c18_i32_6 = arith.constant 18 : i32
    %19 = vector.broadcast %c18_i32_6 : i32 to vector<16x3xi32>
    %20 = arith.cmpi eq, %4, %19 : vector<16x3xi32>
    %21 = arith.ori %18, %20 : vector<16x3xi1>
    %c0_7 = arith.constant 0 : index
    %c18 = arith.constant 18 : index
    %22 = vector.load %arg2[%c0_7, %c18] : memref<16x42xf32, #tpu.memory_space<vmem>>, vector<16x3xf32>
    %c0_8 = arith.constant 0 : index
    %c21 = arith.constant 21 : index
    %23 = vector.load %arg2[%c0_8, %c21] : memref<16x42xf32, #tpu.memory_space<vmem>>, vector<16x3xf32>
    %24 = arith.select %14, %23, %22 : vector<16x3xi1>, vector<16x3xf32>
    %c0_9 = arith.constant 0 : index
    %c18_10 = arith.constant 18 : index
    %25 = vector.load %arg3[%c0_9, %c18_10] : memref<16x42xf32, #tpu.memory_space<vmem>>, vector<16x3xf32>
    tpu.vector_store %arg3[%c0_9, %c18_10], %24 {strides = array<i32>} : memref<16x42xf32, #tpu.memory_space<vmem>>, vector<16x3xf32>,
    %c0_11 = arith.constant 0 : index
    %c21_12 = arith.constant 21 : index
    %26 = vector.load %arg2[%c0_11, %c21_12] : memref<16x42xf32, #tpu.memory_space<vmem>>, vector<16x3xf32>
    %c0_13 = arith.constant 0 : index
    %c18_14 = arith.constant 18 : index
    %27 = vector.load %arg2[%c0_13, %c18_14] : memref<16x42xf32, #tpu.memory_space<vmem>>, vector<16x3xf32>
    %28 = arith.select %14, %27, %26 : vector<16x3xi1>, vector<16x3xf32>
    %c0_15 = arith.constant 0 : index
    %c24 = arith.constant 24 : index
    %29 = vector.load %arg2[%c0_15, %c24] : memref<16x42xf32, #tpu.memory_space<vmem>>, vector<16x3xf32>
    %30 = arith.select %16, %29, %28 : vector<16x3xi1>, vector<16x3xf32>
    %c0_16 = arith.constant 0 : index
    %c21_17 = arith.constant 21 : index
    %31 = vector.load %arg3[%c0_16, %c21_17] : memref<16x42xf32, #tpu.memory_space<vmem>>, vector<16x3xf32>
    tpu.vector_store %arg3[%c0_16, %c21_17], %30 {strides = array<i32>} : memref<16x42xf32, #tpu.memory_space<vmem>>, vector<16x3xf32>,
    %c0_18 = arith.constant 0 : index
    %c24_19 = arith.constant 24 : index
    %32 = vector.load %arg2[%c0_18, %c24_19] : memref<16x42xf32, #tpu.memory_space<vmem>>, vector<16x3xf32>
    %c0_20 = arith.constant 0 : index
    %c21_21 = arith.constant 21 : index
    %33 = vector.load %arg2[%c0_20, %c21_21] : memref<16x42xf32, #tpu.memory_space<vmem>>, vector<16x3xf32>
    %34 = arith.select %16, %33, %32 : vector<16x3xi1>, vector<16x3xf32>
    %c0_22 = arith.constant 0 : index
    %c27 = arith.constant 27 : index
    %35 = vector.load %arg2[%c0_22, %c27] : memref<16x42xf32, #tpu.memory_space<vmem>>, vector<16x3xf32>
    %36 = arith.select %21, %35, %34 : vector<16x3xi1>, vector<16x3xf32>
    %c0_23 = arith.constant 0 : index
    %c24_24 = arith.constant 24 : index
    %37 = vector.load %arg3[%c0_23, %c24_24] : memref<16x42xf32, #tpu.memory_space<vmem>>, vector<16x3xf32>
    tpu.vector_store %arg3[%c0_23, %c24_24], %36 {strides = array<i32>} : memref<16x42xf32, #tpu.memory_space<vmem>>, vector<16x3xf32>,
    %c0_25 = arith.constant 0 : index
    %c27_26 = arith.constant 27 : index
    %38 = vector.load %arg2[%c0_25, %c27_26] : memref<16x42xf32, #tpu.memory_space<vmem>>, vector<16x3xf32>
    %c0_27 = arith.constant 0 : index
    %c24_28 = arith.constant 24 : index
    %39 = vector.load %arg2[%c0_27, %c24_28] : memref<16x42xf32, #tpu.memory_space<vmem>>, vector<16x3xf32>
    %40 = arith.select %21, %39, %38 : vector<16x3xi1>, vector<16x3xf32>
    %c0_29 = arith.constant 0 : index
    %c30 = arith.constant 30 : index
    %41 = vector.load %arg2[%c0_29, %c30] : memref<16x42xf32, #tpu.memory_space<vmem>>, vector<16x3xf32>
    %42 = arith.select %6, %41, %40 : vector<16x3xi1>, vector<16x3xf32>
    %c0_30 = arith.constant 0 : index
    %c27_31 = arith.constant 27 : index
    %43 = vector.load %arg3[%c0_30, %c27_31] : memref<16x42xf32, #tpu.memory_space<vmem>>, vector<16x3xf32>
    tpu.vector_store %arg3[%c0_30, %c27_31], %42 {strides = array<i32>} : memref<16x42xf32, #tpu.memory_space<vmem>>, vector<16x3xf32>,
    %c0_32 = arith.constant 0 : index
    %c30_33 = arith.constant 30 : index
    %44 = vector.load %arg2[%c0_32, %c30_33] : memref<16x42xf32, #tpu.memory_space<vmem>>, vector<16x3xf32>
    %c0_34 = arith.constant 0 : index
    %c27_35 = arith.constant 27 : index
    %45 = vector.load %arg2[%c0_34, %c27_35] : memref<16x42xf32, #tpu.memory_space<vmem>>, vector<16x3xf32>
    %46 = arith.select %6, %45, %44 : vector<16x3xi1>, vector<16x3xf32>
    %c0_36 = arith.constant 0 : index
    %c30_37 = arith.constant 30 : index
    %47 = vector.load %arg3[%c0_36, %c30_37] : memref<16x42xf32, #tpu.memory_space<vmem>>, vector<16x3xf32>
    tpu.vector_store %arg3[%c0_36, %c30_37], %46 {strides = array<i32>} : memref<16x42xf32, #tpu.memory_space<vmem>>, vector<16x3xf32>,
    return
  }
  func.func @transform_0(%arg0: i32) -> (i32, i32) {
    %c0_i32 = arith.constant 0 : i32
    %c0_i32_0 = arith.constant 0 : i32
    return %arg0, %c0_i32 : i32, i32
  }
  func.func @transform_1(%arg0: i32) -> (i32, i32) {
    %c0_i32 = arith.constant 0 : i32
    %c0_i32_0 = arith.constant 0 : i32
    return %arg0, %c0_i32 : i32, i32
  }
  func.func @transform_2(%arg0: i32) -> (i32, i32) {
    %c0_i32 = arith.constant 0 : i32
    %c0_i32_0 = arith.constant 0 : i32
    return %arg0, %c0_i32 : i32, i32
  }
}

</mosaic_0001>

<bundles_post_ra>
// kernel: _lambda_.1
= control target key start
LH: loop header
LB: loop body
LE: loop exit
PB: predicated region body
PF: predicated region fallthrough
CT: control target
= control target key end

     0   :  { %v194_v0 = vmov 0   ;;  %s195_s13 = smov 125   ;;  %vm13_vm9 = vcmask 343040   ;;  %s359_s1 = inlined_call_operand.vmem [shape: f32[16,42], index: 1, kind: input, shape index: {}]   ;;  %s360_s0 = inlined_call_operand.vmem [shape: s32[16,1], index: 0, kind: input, shape index: {}]   ;;  %s361_s2 = inlined_call_operand.vmem [shape: f32[16,42], index: 2, kind: output, shape index: {}]  }
   0x1   :  { %193 = vset.pattern.permute.xlu0 %v194_v0  ;;  %v216_v1 = vld [vmem:[%s359_s1] sm:$0xff]  ;;  %v226_v3 = vld [vmem:[%s359_s1 + $0x8] sm:$0xff]  ;;  %s196_s1 = smov 3  }
   0x2   :  { %v16_v2 = vld [vmem:[%s360_s0] sm:$0xff]  ;;  %67 = vrot.lane.b32.xlu1 %v216_v1, %s195_s13  ;;  %v17_v4 = vld [vmem:[%s360_s0 + $0x8] sm:$0xff]  ;;  %s197_s0 = smov 6   ;;  %15 = vst.msk [vmem:[%s361_s2 + $0x8] sm:$0xff] %vm13_vm9, %v226_v3 }
   0x3   :  { %19 = vperm.xlu0 %193, %v16_v2   ;;  %14 = vst.msk [vmem:[%s361_s2] sm:$0xff] %vm13_vm9, %v216_v1 }
   0x6   :  { %69 = vrot.lane.b32.xlu1 %v226_v3, %s195_s13 }
   0x7   :  { %22 = vperm.xlu0 %193, %v17_v4  }
   0xa   :  { %102 = vrot.lane.b32.xlu1 %v226_v3, %s195_s13 }
   0xb   :  { %100 = vrot.lane.b32.xlu0 %v216_v1, %s195_s13 }
   0xe   :  { %135 = vrot.lane.b32.xlu1 %v226_v3, %s195_s13 }
   0xf   :  { %133 = vrot.lane.b32.xlu0 %v216_v1, %s195_s13 }
  0x12   :  { %46 = vrot.lane.b32.xlu1 %v226_v3, %s196_s1 }
  0x13   :  { %44 = vrot.lane.b32.xlu0 %v216_v1, %s196_s1 }
  0x74   :  { %v68_v5 = vpop.permute.xlu1 %67 }
  0x78   :  { %v70_v6 = vpop.permute.xlu1 %69 }
  0x7c   :  { %v103_v8 = vpop.permute.xlu1 %102 }
  0x7e   :  { %v245_v7 = vpop.permute.xlu0 %19 }
  0x7f   :  { %vm28_vm5 = vcmp.eq.s32.totalorder %v245_v7, 13  ;;  %vm26_vm6 = vcmp.eq.s32.totalorder %v245_v7, 3  ;;  %vm36_vm7 = vcmp.eq.s32.totalorder %v245_v7, 6  ;;  %vm32_vm10 = vcmp.eq.s32.totalorder %v245_v7, 18 }
  0x80   :  { %v136_v13 = vpop.permute.xlu1 %135  ;;  %vm30_vm11 = vmor %vm26_vm6, %vm28_vm5 }
  0x81   :  { %vm286_vm13 = vmor %vm28_vm5, %vm32_vm10  ;;  %vm182_vm5 = vcmask 269552  }
  0x82   :  { %v247_v9 = vpop.permute.xlu0 %22  ;;  %vm34_vm14 = vmor %vm30_vm11, %vm32_vm10 }
  0x83   :  { %vm37_vm0 = vcmp.eq.s32.totalorder %v247_v9, 6  ;;  %vm29_vm1 = vcmp.eq.s32.totalorder %v247_v9, 13  ;;  %vm33_vm2 = vcmp.eq.s32.totalorder %v247_v9, 18  ;;  %vm27_vm3 = vcmp.eq.s32.totalorder %v247_v9, 3 }
  0x84   :  { %v107_v10 = vsel %vm37_vm0, %v226_v3, %v103_v8  ;;  %vm258_vm4 = vmor %vm29_vm1, %vm33_vm2  ;;  %v73_v20 = vsel %vm34_vm14, %v216_v1, %v68_v5  ;;  %v47_v21 = vpop.permute.xlu1 %46  ;;  %vm25_vm15 = vcmp.eq.s32.totalorder %v247_v9, 1 }
  0x85   :  { %112 = vrot.lane.b32.xlu1 %v107_v10, %s197_s0  ;;  %vm31_vm8 = vmor %vm27_vm3, %vm29_vm1  ;;  %v140_v15 = vsel %vm258_vm4, %v226_v3, %v136_v13  ;;  %vm24_vm1 = vcmp.eq.s32.totalorder %v245_v7, 1  ;;  %vm126_vm3 = vcmask 220352  }
  0x86   :  { %v101_v12 = vpop.permute.xlu0 %100  ;;  %vm35_vm12 = vmor %vm31_vm8, %vm33_vm2  ;;  %vm60_vm2 = vcmask 171152  }
  0x87   :  { %v106_v14 = vsel %vm36_vm7, %v216_v1, %v101_v12  ;;  %v74_v19 = vsel %vm35_vm12, %v226_v3, %v70_v6  ;;  %v51_v23 = vsel %vm35_vm12, %v226_v3, %v47_v21 }
  0x88   :  { %110 = vrot.lane.b32.xlu0 %v106_v14, %s197_s0 }
  0x89   :  { %145 = vrot.lane.b32.xlu1 %v140_v15, %s197_s0 }
  0x8a   :  { %v134_v16 = vpop.permute.xlu0 %133 }
  0x8b   :  { %v139_v18 = vsel %vm286_vm13, %v216_v1, %v134_v16 }
  0x8c   :  { %143 = vrot.lane.b32.xlu0 %v139_v18, %s197_s0 }
  0x8d   :  { %79 = vrot.lane.b32.xlu1 %v74_v19, %s197_s0 }
  0x8e   :  { %v45_v22 = vpop.permute.xlu0 %44 }
  0x8f   :  { %v50_v24 = vsel %vm34_vm14, %v216_v1, %v45_v22 }
  0x90   :  { %77 = vrot.lane.b32.xlu0 %v73_v20, %s197_s0 }
  0x91   :  { %168 = vrot.lane.b32.xlu1 %v226_v3, %s195_s13 }
  0x94   :  { %166 = vrot.lane.b32.xlu0 %v216_v1, %s195_s13 }
  0x95   :  { %56 = vrot.lane.b32.xlu1 %v51_v23, %s195_s13 }
  0x98   :  { %54 = vrot.lane.b32.xlu0 %v50_v24, %s195_s13 }
  0xf7   :  { %v113_v25 = vpop.permute.xlu1 %112 }
  0xf8   :  { %v117_v26 = vsel %vm258_vm4, %v226_v3, %v113_v25  ;;  %vm159_vm4 = vcmask 244952  }
  0xf9   :  { %122 = vrot.lane.b32.xlu1 %v117_v26, %s195_s13 }
  0xfa   :  { %v111_v27 = vpop.permute.xlu0 %110 }
  0xfb   :  { %v146_v28 = vpop.permute.xlu1 %145  ;;  %v116_v29 = vsel %vm286_vm13, %v216_v1, %v111_v27 }
  0xfc   :  { %120 = vrot.lane.b32.xlu0 %v116_v29, %s195_s13  ;;  %v150_v30 = vsel %vm25_vm15, %v226_v3, %v146_v28 }
  0xfd   :  { %155 = vrot.lane.b32.xlu1 %v150_v30, %s195_s13 }
  0xfe   :  { %v144_v31 = vpop.permute.xlu0 %143 }
  0xff   :  { %v80_v32 = vpop.permute.xlu1 %79  ;;  %v149_v33 = vsel %vm24_vm1, %v216_v1, %v144_v31 }
 0x100   :  { %153 = vrot.lane.b32.xlu0 %v149_v33, %s195_s13  ;;  %v84_v34 = vsel %vm37_vm0, %v226_v3, %v80_v32  ;;  %vm93_vm0 = vcmask 195752  }
 0x101   :  { %89 = vrot.lane.b32.xlu1 %v84_v34, %s195_s13 }
 0x102   :  { %v78_v35 = vpop.permute.xlu0 %77 }
 0x103   :  { %v169_v36 = vpop.permute.xlu1 %168  ;;  %v83_v37 = vsel %vm36_vm7, %v216_v1, %v78_v35 }
 0x104   :  { %87 = vrot.lane.b32.xlu0 %v83_v37, %s195_s13  ;;  %v173_v38 = vsel %vm25_vm15, %v226_v3, %v169_v36 }
 0x105   :  { %178 = vrot.lane.b32.xlu1 %v173_v38, %s196_s1 }
 0x106   :  { %v167_v39 = vpop.permute.xlu0 %166 }
 0x107   :  { %v57_v40 = vpop.permute.xlu1 %56  ;;  %v172_v41 = vsel %vm24_vm1, %v216_v1, %v167_v39 }
 0x108   :  { %62 = vst.msk [vmem:[%s361_s2 + $0x8] sm:$0xff] %vm60_vm2, %v57_v40  ;;  %176 = vrot.lane.b32.xlu0 %v172_v41, %s196_s1 }
 0x10a   :  { %v55_v42 = vpop.permute.xlu0 %54 }
 0x10b   :  { %61 = vst.msk [vmem:[%s361_s2] sm:$0xff] %vm60_vm2, %v55_v42 }
 0x16b   :  { %v123_v43 = vpop.permute.xlu1 %122 }
 0x16e   :  { %v121_v44 = vpop.permute.xlu0 %120 }
 0x16f   :  { %v156_v45 = vpop.permute.xlu1 %155 }
 0x172   :  { %v154_v46 = vpop.permute.xlu0 %153 }
 0x173   :  { %v90_v47 = vpop.permute.xlu1 %89 }
 0x174   :  { %95 = vst.msk [vmem:[%s361_s2 + $0x8] sm:$0xff] %vm93_vm0, %v90_v47 }
 0x175   :  { %128 = vst.msk [vmem:[%s361_s2 + $0x8] sm:$0xff] %vm126_vm3, %v123_v43 }
 0x176   :  { %v88_v48 = vpop.permute.xlu0 %87  ;;  %161 = vst.msk [vmem:[%s361_s2 + $0x8] sm:$0xff] %vm159_vm4, %v156_v45 }
 0x177   :  { %94 = vst.msk [vmem:[%s361_s2] sm:$0xff] %vm93_vm0, %v88_v48  ;;  %v179_v49 = vpop.permute.xlu1 %178 }
 0x178   :  { %127 = vst.msk [vmem:[%s361_s2] sm:$0xff] %vm126_vm3, %v121_v44 }
 0x179   :  { %184 = vst.msk [vmem:[%s361_s2 + $0x8] sm:$0xff] %vm182_vm5, %v179_v49 }
 0x17a   :  { %160 = vst.msk [vmem:[%s361_s2] sm:$0xff] %vm159_vm4, %v154_v46  ;;  %v177_v50 = vpop.permute.xlu0 %176 }
 0x17b   :  { %183 = vst.msk [vmem:[%s361_s2] sm:$0xff] %vm182_vm5, %v177_v50 }

</bundles_post_ra>
